<compile_context>
chip_gen: v5e
topology: v5e:2x2
jax: 0.10.0
libtpu: 0.0.40
codegen_flags: <defaults>
</compile_context>

<pallas_src>
import jax
import jax.numpy as jnp
from jax.experimental import pallas as pl
from jax.experimental.pallas import tpu as pltpu


MXU_M = 128         # preferred batch-tile granularity (MXU rows)
MAX_TILE_B = 8192   # rows per grid step for large batches (~11 MiB live VMEM)


def _round_up(n: int, m: int) -> int:
    return ((n + m - 1) // m) * m


def decoder_stacked_kernel(x_ref, w1_ref, b1_ref, w2_ref, b2_ref, w3_ref, b3_ref, o_ref):
    # fc1 + ReLU
    h1 = jnp.dot(x_ref[...], w1_ref[...], preferred_element_type=jnp.float32) + b1_ref[...]
    h1 = jnp.maximum(h1, 0.0)
    # fc2 + ReLU
    h2 = jnp.dot(h1, w2_ref[...], preferred_element_type=jnp.float32) + b2_ref[...]
    h2 = jnp.maximum(h2, 0.0)
    # fc3 (no activation), stored lane-unpadded (masked vst is fine; HBM-bound)
    out = jnp.dot(h2, w3_ref[...], preferred_element_type=jnp.float32) + b3_ref[...]
    o_ref[...] = out.astype(o_ref.dtype)


def decoder_stacked_forward(x, params, *, embedding_size, n_timesteps, n_features):
    """Reshape to (batch, embedding_size) and run the fused, batch-tiled MLP kernel."""
    w1, b1, w2, b2, w3, b3 = params
    batch = x.shape[0]
    out_dim = n_timesteps * n_features

    x2d = x.reshape((batch, embedding_size)).astype(jnp.float32)
    w1 = w1.astype(jnp.float32); b1 = b1.astype(jnp.float32)
    w2 = w2.astype(jnp.float32); b2 = b2.astype(jnp.float32)
    w3 = w3.astype(jnp.float32); b3 = b3.astype(jnp.float32)

    # ---- batch-tile selection (no padding passes) ---------------------------
    if batch <= MXU_M:
        # Single block equal to the full batch: block dim == array dim is legal
        # for any size, so tiny batches (e.g. 2) need no row padding at all.
        tile_b = batch
    else:
        # >=2 grid steps so v7x's two TensorCores both get work; tiles are
        # multiples of 128 rows, and Pallas masks the partial last block.
        num_steps = max(pl.cdiv(batch, MAX_TILE_B), 2)
        tile_b = min(MAX_TILE_B, _round_up(pl.cdiv(batch, num_steps), MXU_M))
        tile_b = min(tile_b, batch)
    grid = (pl.cdiv(batch, tile_b),)

    # x / out are streamed per-tile; weights/biases use constant index_maps so
    # they are DMA'd once and stay resident in VMEM across all grid steps.
    in_specs = [
        pl.BlockSpec((tile_b, embedding_size), lambda i: (i, 0)),   # x tile
        pl.BlockSpec(w1.shape, lambda i: (0, 0)),                   # w1 (32,64)
        pl.BlockSpec(b1.shape, lambda i: (0, 0)),                   # b1 (1,64)
        pl.BlockSpec(w2.shape, lambda i: (0, 0)),                   # w2 (64,128)
        pl.BlockSpec(b2.shape, lambda i: (0, 0)),                   # b2 (1,128)
        pl.BlockSpec(w3.shape, lambda i: (0, 0)),                   # w3 (128,out)
        pl.BlockSpec(b3.shape, lambda i: (0, 0)),                   # b3 (1,out)
    ]
    out_spec = pl.BlockSpec((tile_b, out_dim), lambda i: (i, 0))

    flops = 2 * batch * (embedding_size * 64 + 64 * 128 + 128 * out_dim)
    bytes_accessed = 4 * (
        batch * (embedding_size + out_dim)
        + embedding_size * 64 + 64
        + 64 * 128 + 128
        + 128 * out_dim + out_dim
    )

    out = pl.pallas_call(
        decoder_stacked_kernel,
        out_shape=jax.ShapeDtypeStruct((batch, out_dim), jnp.float32),
        grid=grid,
        in_specs=in_specs,
        out_specs=out_spec,
        compiler_params=pltpu.CompilerParams(
            dimension_semantics=("parallel",),
            vmem_limit_bytes=32 * 1024 * 1024,
        ),
        cost_estimate=pl.CostEstimate(
            flops=flops, transcendentals=0, bytes_accessed=bytes_accessed),
    )(x2d, w1, b1, w2, b2, w3, b3)

    return out


def init_params(key, n_timesteps, n_features):
    """Deterministic synthetic parameters matching nn.Linear shapes.

    fc1: Linear(32, 64), fc2: Linear(64, 128), fc3: Linear(128, T*F).
    Stored as (in, out) (torch W transposed) plus (1, out) biases.
    """
    out_dim = n_timesteps * n_features
    keys = jax.random.split(key, 6)

    def lin(kw, kb, fan_in, fan_out):
        bound = 1.0 / jnp.sqrt(jnp.float32(fan_in))
        w = jax.random.uniform(kw, (fan_in, fan_out), jnp.float32, -bound, bound)
        b = jax.random.uniform(kb, (1, fan_out), jnp.float32, -bound, bound)
        return w, b

    w1, b1 = lin(keys[0], keys[1], 32, 64)
    w2, b2 = lin(keys[2], keys[3], 64, 128)
    w3, b3 = lin(keys[4], keys[5], 128, out_dim)
    return (w1, b1, w2, b2, w3, b3)


def reference_forward(x, params, *, embedding_size):
    w1, b1, w2, b2, w3, b3 = params
    x2d = x.reshape((x.shape[0], embedding_size)).astype(jnp.float32)
    h1 = jnp.maximum(x2d @ w1 + b1, 0.0)
    h2 = jnp.maximum(h1 @ w2 + b2, 0.0)
    return h2 @ w3 + b3


if __name__ == "__main__":
    # Module hyperparameters (embedding_size must be 32 since fc1 = Linear(32, 64)).
    batch_size = 2
    embedding_size = 32
    n_timesteps = 8
    n_features = 4

    key = jax.random.PRNGKey(0)
    k_x, k_p = jax.random.split(key)

    # Input with 32 elements per example; forward reshapes to (batch, 32).
    x = jax.random.normal(k_x, (batch_size, embedding_size), dtype=jnp.float32)
    params = init_params(k_p, n_timesteps, n_features)

    out = decoder_stacked_forward(
        x, params,
        embedding_size=embedding_size,
        n_timesteps=n_timesteps,
        n_features=n_features,
    )
    out = jax.block_until_ready(out)

    ref = reference_forward(x, params, embedding_size=embedding_size)
    assert out.shape == (batch_size, n_timesteps * n_features)
    assert jnp.allclose(out, ref, atol=1e-5, rtol=1e-5)

    print("KERNEL_OK")
</pallas_src>

<mosaic_0001>
module attributes {stable_mosaic.version = 11 : i64} {
  func.func @decoder_stacked_kernel(%arg0: i32, %arg1: memref<2x32xf32, #tpu.memory_space<vmem>>, %arg2: memref<32x64xf32, #tpu.memory_space<vmem>>, %arg3: memref<1x64xf32, #tpu.memory_space<vmem>>, %arg4: memref<64x128xf32, #tpu.memory_space<vmem>>, %arg5: memref<1x128xf32, #tpu.memory_space<vmem>>, %arg6: memref<128x32xf32, #tpu.memory_space<vmem>>, %arg7: memref<1x32xf32, #tpu.memory_space<vmem>>, %arg8: memref<2x32xf32, #tpu.memory_space<vmem>>) attributes {dimension_semantics = [#tpu.dimension_semantics<parallel>], iteration_bounds = array<i64: 1>, scalar_prefetch = 0 : i64, scratch_operands = 0 : i64, tpu.core_type = #tpu.core_type<tc>, window_params = [{transform_indices = @transform_0, window_bounds = array<i64: 2, 32>}, {pipeline_mode = #tpu.pipeline_mode<synchronous>, transform_indices = @transform_1, window_bounds = array<i64: 32, 64>}, {pipeline_mode = #tpu.pipeline_mode<synchronous>, transform_indices = @transform_2, window_bounds = array<i64: 1, 64>}, {pipeline_mode = #tpu.pipeline_mode<synchronous>, transform_indices = @transform_3, window_bounds = array<i64: 64, 128>}, {pipeline_mode = #tpu.pipeline_mode<synchronous>, transform_indices = @transform_4, window_bounds = array<i64: 1, 128>}, {pipeline_mode = #tpu.pipeline_mode<synchronous>, transform_indices = @transform_5, window_bounds = array<i64: 128, 32>}, {pipeline_mode = #tpu.pipeline_mode<synchronous>, transform_indices = @transform_6, window_bounds = array<i64: 1, 32>}, {transform_indices = @transform_7, window_bounds = array<i64: 2, 32>}]} {
    %c0 = arith.constant 0 : index
    %c0_0 = arith.constant 0 : index
    %0 = vector.load %arg1[%c0, %c0_0] : memref<2x32xf32, #tpu.memory_space<vmem>>, vector<2x32xf32>
    %c0_1 = arith.constant 0 : index
    %c0_2 = arith.constant 0 : index
    %1 = vector.load %arg2[%c0_1, %c0_2] : memref<32x64xf32, #tpu.memory_space<vmem>>, vector<32x64xf32>
    %cst = arith.constant dense<0.000000e+00> : vector<2x64xf32>
    %2 = tpu.matmul %0, %1, %cst {dimension_numbers = #tpu.dot_dimension_numbers<[1], [0], [0], [1], [0, 0, 1, 1], [], []>} : vector<2x32xf32>, vector<32x64xf32>, vector<2x64xf32> -> vector<2x64xf32>
    %c0_3 = arith.constant 0 : index
    %c0_4 = arith.constant 0 : index
    %3 = vector.load %arg3[%c0_3, %c0_4] : memref<1x64xf32, #tpu.memory_space<vmem>>, vector<1x64xf32>
    %4 = vector.broadcast %3 : vector<1x64xf32> to vector<2x64xf32>
    %5 = arith.addf %2, %4 : vector<2x64xf32>
    %cst_5 = arith.constant 0.000000e+00 : f32
    %6 = vector.broadcast %cst_5 : f32 to vector<2x64xf32>
    %7 = arith.maximumf %5, %6 : vector<2x64xf32>
    %c0_6 = arith.constant 0 : index
    %c0_7 = arith.constant 0 : index
    %8 = vector.load %arg4[%c0_6, %c0_7] : memref<64x128xf32, #tpu.memory_space<vmem>>, vector<64x128xf32>
    %cst_8 = arith.constant dense<0.000000e+00> : vector<2x128xf32>
    %9 = tpu.matmul %7, %8, %cst_8 {dimension_numbers = #tpu.dot_dimension_numbers<[1], [0], [0], [1], [0, 0, 1, 1], [], []>} : vector<2x64xf32>, vector<64x128xf32>, vector<2x128xf32> -> vector<2x128xf32>
    %c0_9 = arith.constant 0 : index
    %c0_10 = arith.constant 0 : index
    %10 = vector.load %arg5[%c0_9, %c0_10] : memref<1x128xf32, #tpu.memory_space<vmem>>, vector<1x128xf32>
    %11 = vector.broadcast %10 : vector<1x128xf32> to vector<2x128xf32>
    %12 = arith.addf %9, %11 : vector<2x128xf32>
    %cst_11 = arith.constant 0.000000e+00 : f32
    %13 = vector.broadcast %cst_11 : f32 to vector<2x128xf32>
    %14 = arith.maximumf %12, %13 : vector<2x128xf32>
    %c0_12 = arith.constant 0 : index
    %c0_13 = arith.constant 0 : index
    %15 = vector.load %arg6[%c0_12, %c0_13] : memref<128x32xf32, #tpu.memory_space<vmem>>, vector<128x32xf32>
    %cst_14 = arith.constant dense<0.000000e+00> : vector<2x32xf32>
    %16 = tpu.matmul %14, %15, %cst_14 {dimension_numbers = #tpu.dot_dimension_numbers<[1], [0], [0], [1], [0, 0, 1, 1], [], []>} : vector<2x128xf32>, vector<128x32xf32>, vector<2x32xf32> -> vector<2x32xf32>
    %c0_15 = arith.constant 0 : index
    %c0_16 = arith.constant 0 : index
    %17 = vector.load %arg7[%c0_15, %c0_16] : memref<1x32xf32, #tpu.memory_space<vmem>>, vector<1x32xf32>
    %18 = vector.broadcast %17 : vector<1x32xf32> to vector<2x32xf32>
    %19 = arith.addf %16, %18 : vector<2x32xf32>
    %c0_17 = arith.constant 0 : index
    %c0_18 = arith.constant 0 : index
    %20 = vector.load %arg8[%c0_17, %c0_18] : memref<2x32xf32, #tpu.memory_space<vmem>>, vector<2x32xf32>
    tpu.vector_store %arg8[%c0_17, %c0_18], %19 {strides = array<i32>} : memref<2x32xf32, #tpu.memory_space<vmem>>, vector<2x32xf32>,
    return
  }
  func.func @transform_0(%arg0: i32) -> (i32, i32) {
    %c0_i32 = arith.constant 0 : i32
    %c0_i32_0 = arith.constant 0 : i32
    return %arg0, %c0_i32 : i32, i32
  }
  func.func @transform_1(%arg0: i32) -> (i32, i32) {
    %c0_i32 = arith.constant 0 : i32
    %c0_i32_0 = arith.constant 0 : i32
    %c0_i32_1 = arith.constant 0 : i32
    return %c0_i32, %c0_i32_0 : i32, i32
  }
  func.func @transform_2(%arg0: i32) -> (i32, i32) {
    %c0_i32 = arith.constant 0 : i32
    %c0_i32_0 = arith.constant 0 : i32
    %c0_i32_1 = arith.constant 0 : i32
    return %c0_i32, %c0_i32_0 : i32, i32
  }
  func.func @transform_3(%arg0: i32) -> (i32, i32) {
    %c0_i32 = arith.constant 0 : i32
    %c0_i32_0 = arith.constant 0 : i32
    %c0_i32_1 = arith.constant 0 : i32
    return %c0_i32, %c0_i32_0 : i32, i32
  }
  func.func @transform_4(%arg0: i32) -> (i32, i32) {
    %c0_i32 = arith.constant 0 : i32
    %c0_i32_0 = arith.constant 0 : i32
    %c0_i32_1 = arith.constant 0 : i32
    return %c0_i32, %c0_i32_0 : i32, i32
  }
  func.func @transform_5(%arg0: i32) -> (i32, i32) {
    %c0_i32 = arith.constant 0 : i32
    %c0_i32_0 = arith.constant 0 : i32
    %c0_i32_1 = arith.constant 0 : i32
    return %c0_i32, %c0_i32_0 : i32, i32
  }
  func.func @transform_6(%arg0: i32) -> (i32, i32) {
    %c0_i32 = arith.constant 0 : i32
    %c0_i32_0 = arith.constant 0 : i32
    %c0_i32_1 = arith.constant 0 : i32
    return %c0_i32, %c0_i32_0 : i32, i32
  }
  func.func @transform_7(%arg0: i32) -> (i32, i32) {
    %c0_i32 = arith.constant 0 : i32
    %c0_i32_0 = arith.constant 0 : i32
    return %arg0, %c0_i32 : i32, i32
  }
}

</mosaic_0001>

<bundles_post_ra>
// kernel: tpu_custom_call.1
= control target key start
LH: loop header
LB: loop body
LE: loop exit
PB: predicated region body
PF: predicated region fallthrough
CT: control target
= control target key end

     0   :  { %s328_s0 = inlined_call_operand.vmem [shape: f32[2,32], index: 0, kind: input, shape index: {}]   ;;  %s329_s1 = inlined_call_operand.vmem [shape: f32[32,64], index: 1, kind: input, shape index: {}]   ;;  %s330_s2 = inlined_call_operand.vmem [shape: f32[1,64], index: 2, kind: input, shape index: {}]   ;;  %s331_s3 = inlined_call_operand.vmem [shape: f32[64,128], index: 3, kind: input, shape index: {}]   ;;  %s332_s4 = inlined_call_operand.vmem [shape: f32[1,128], index: 4, kind: input, shape index: {}]   ;;  %s333_s5 = inlined_call_operand.vmem [shape: f32[128,32], index: 5, kind: input, shape index: {}]   ;;  %s334_s6 = inlined_call_operand.vmem [shape: f32[1,32], index: 6, kind: input, shape index: {}]   ;;  %s335_s7 = inlined_call_operand.hbm [shape: f32[2,32], index: 7, kind: output, shape index: {}]  }
   0x1   :  { %v31_v0 = vld [vmem:[%s329_s1 + $0x18] sm:$0xff]  ;;  %v30_v1 = vld [vmem:[%s329_s1 + $0x10] sm:$0xff]  ;;  %v29_v3 = vld [vmem:[%s329_s1 + $0x8] sm:$0xff] }
   0x2   :  { %52 = vmatpush.msra.mxu0 %v31_v0  ;;  %v68_v2 = vld [vmem:[%s331_s3 + $0x38] sm:$0xff]  ;;  %v67_v4 = vld [vmem:[%s331_s3 + $0x30] sm:$0xff]  ;;  %v28_v5 = vld [vmem:[%s329_s1] sm:$0xff] }
   0x3   :  { %85 = vmatpush.msra.mxu1 %v68_v2  ;;  %v66_v6 = vld [vmem:[%s331_s3 + $0x28] sm:$0xff] }
   0x4   :  { %53 = vmatpush.msra.mxu0 %v30_v1 }
   0x5   :  { %86 = vmatpush.msra.mxu1 %v67_v4 }
   0x6   :  { %12 = vsyncpa [#allocation3], 0  ;;  %54 = vmatpush.msra.mxu0 %v29_v3  ;;  %v27_v7 = vld [vmem:[%s328_s0] sm:$0x3]  ;;  %vm36_vm0 = vcmask 261120   ;;  %v64_v9 = vld [vmem:[%s331_s3 + $0x18] sm:$0xff] }
   0x7   :  { %v65_v8 = vld [vmem:[%s331_s3 + $0x20] sm:$0xff]  ;;  %87 = vmatpush.msra.mxu1 %v66_v6  ;;  %v63_v10 = vld [vmem:[%s331_s3 + $0x10] sm:$0xff]  ;;  %v62_v11 = vld [vmem:[%s331_s3 + $0x8] sm:$0xff]  ;;  %vm73_vm1 = vcmask 523264   ;;  %s188_s12 = smov [#allocation2]   ;;  %s147_s16 = sshll.u32 %s335_s7, 4  ;;  %s148_s16 = int_to_ptr.hbm [resolvable:$true] %s147_s16 }
   0x8   :  { %55 = vmatpush.msra.mxu0 %v28_v5  ;;  %v61_v12 = vld [vmem:[%s331_s3] sm:$0xff]  ;;  %v113_v13 = vld [vmem:[%s333_s5 + $0x78] sm:$0xff]  ;;  %v112_v14 = vld [vmem:[%s333_s5 + $0x70] sm:$0xff]  ;;  %s145_s13 = sshll.u32 %s188_s12, 4  ;;  %vm138_vm2 = vcmask 254976   ;;  %s146_s13 = int_to_ptr.vmem [resolvable:$true] %s145_s13 }
   0x9   :  { %156 = vmatmul.msk.f32.vlgmr.msra.gmra.mxu0 %vm36_vm0, %v27_v7  ;;  %88 = vmatpush.msra.mxu1 %v65_v8  ;;  %v111_v15 = vld [vmem:[%s333_s5 + $0x68] sm:$0xff]  ;;  %v110_v16 = vld [vmem:[%s333_s5 + $0x60] sm:$0xff]  ;;  %v109_v17 = vld [vmem:[%s333_s5 + $0x58] sm:$0xff] }
   0xa   :  { %118 = vmatpush.msra.mxu2 %v113_v13  ;;  %v108_v18 = vld [vmem:[%s333_s5 + $0x50] sm:$0xff]  ;;  %v107_v19 = vld [vmem:[%s333_s5 + $0x48] sm:$0xff]  ;;  %v106_v20 = vld [vmem:[%s333_s5 + $0x40] sm:$0xff] }
   0xb   :  { %89 = vmatpush.msra.mxu1 %v64_v9  ;;  %v105_v21 = vld [vmem:[%s333_s5 + $0x38] sm:$0xff]  ;;  %v104_v22 = vld [vmem:[%s333_s5 + $0x30] sm:$0xff]  ;;  %v103_v23 = vld [vmem:[%s333_s5 + $0x28] sm:$0xff] }
   0xc   :  { %119 = vmatpush.msra.mxu2 %v112_v14  ;;  %v102_v24 = vld [vmem:[%s333_s5 + $0x20] sm:$0xff]  ;;  %v101_v25 = vld [vmem:[%s333_s5 + $0x18] sm:$0xff]  ;;  %v100_v30 = vld [vmem:[%s333_s5 + $0x10] sm:$0xff] }
   0xd   :  { %90 = vmatpush.msra.mxu1 %v63_v10  ;;  %v159_v26 = vld [vmem:[%s330_s2] ss:$0 sm:$0xff]  ;;  %v99_v31 = vld [vmem:[%s333_s5 + $0x8] sm:$0xff] }
   0xe   :  { %120 = vmatpush.msra.mxu2 %v111_v15  ;;  %v98_v32 = vld [vmem:[%s333_s5] sm:$0xff] }
   0xf   :  { %91 = vmatpush.msra.mxu1 %v62_v11  ;;  %v160_v33 = vld [vmem:[%s332_s4] ss:$0 sm:$0xff] }
  0x10   :  { %121 = vmatpush.msra.mxu2 %v110_v16  ;;  %v161_v37 = vld [vmem:[%s334_s6] ss:$0 sm:$0xff] }
  0x11   :  { %92 = vmatpush.msra.mxu1 %v61_v12 }
  0x12   :  { %122 = vmatpush.msra.mxu2 %v109_v17 }
  0x14   :  { %123 = vmatpush.msra.mxu2 %v108_v18 }
  0x16   :  { %124 = vmatpush.msra.mxu2 %v107_v19 }
  0x18   :  { %125 = vmatpush.msra.mxu2 %v106_v20 }
  0x1a   :  { %126 = vmatpush.msra.mxu2 %v105_v21 }
  0x1c   :  { %127 = vmatpush.msra.mxu2 %v104_v22 }
  0x1e   :  { %128 = vmatpush.msra.mxu2 %v103_v23 }
  0x20   :  { %129 = vmatpush.msra.mxu2 %v102_v24 }
  0x22   :  { %130 = vmatpush.msra.mxu2 %v101_v25 }
  0x24   :  { %131 = vmatpush.msra.mxu2 %v100_v30 }
  0x26   :  { %132 = vmatpush.msra.mxu2 %v99_v31 }
  0x28   :  { %133 = vmatpush.msra.mxu2 %v98_v32 }
  0x86   :  { %v57_v27 = vpop.f32.mrf.mxu0 }
  0x87   :  { %v58_v28 = vadd.f32 %v159_v26, %v57_v27 }
  0x89   :  { %v60_v29 = vmax.f32 %v58_v28, 0.0 }
  0x8b   :  { %157 = vmatmul.msk.f32.vlgmr.msra.gmra.mxu1 %vm73_vm1, %v60_v29 }
 0x108   :  { %v94_v34 = vpop.f32.mrf.mxu1 }
 0x109   :  { %v95_v35 = vadd.f32 %v160_v33, %v94_v34 }
 0x10b   :  { %v97_v36 = vmax.f32 %v95_v35, 0.0 }
 0x10d   :  { %134 = vmatmul.f32.vlgmr.msra.gmra.mxu2 %v97_v36 }
 0x190   :  { %v135_v38 = vpop.f32.mrf.mxu2 }
 0x191   :  { %v136_v39 = vadd.f32 %v161_v37, %v135_v38 }
 0x193   :  { %139 = vst.msk [vmem:[#allocation2] sm:$0x3] %vm138_vm2, %v136_v39 }
 0x194   :  { %150 = dma.vmem_to_hbm [thread:$0]  %s146_s13, 32, %s148_s16, [#allocation3]  }
 0x195   :  { %186 = dma.done.wait [#allocation3], 32  }
 0x196   :  { %187 = vsyncadd [#allocation3], 4294967264 }
 0x197   :  { %155 = vsyncpa [#allocation3], 1 }

</bundles_post_ra>
